<compile_context>
chip_gen: v5e
topology: v5e:2x2
jax: 0.10.0
libtpu: 0.0.40
codegen_flags: <defaults>
</compile_context>

<pallas_src>
import functools

import jax
import jax.numpy as jnp
from jax.experimental import pallas as pl
from jax.experimental.pallas import tpu as pltpu


def _torgb_skip_kernel(x_ref, w_ref, b_ref, skip_ref, o_ref):
    # x_ref:    (TM, g*C_in)   packed input tile
    # w_ref:    (g*C_in, g*R)  block-diagonal packed weight (tiny, constant block)
    # b_ref:    (1, g*R)       packed bias row (f32)
    # skip_ref: (TM, g*R)      packed skip tile (native dtype, cast to f32 here)
    # o_ref:    (TM, g*R)      packed output tile
    acc = jnp.dot(x_ref[...], w_ref[...], preferred_element_type=jnp.float32)
    acc = acc + b_ref[...] + skip_ref[...].astype(jnp.float32)
    o_ref[...] = acc.astype(o_ref.dtype)


def _torgb_kernel(x_ref, w_ref, b_ref, o_ref):
    acc = jnp.dot(x_ref[...], w_ref[...], preferred_element_type=jnp.float32)
    acc = acc + b_ref[...]
    o_ref[...] = acc.astype(o_ref.dtype)


def _pack_weight(weight_math, g):
    """weight_math: (C_in, R) -> block-diagonal (g*C_in, g*R)."""
    if g == 1:
        return weight_math
    c, r = weight_math.shape
    wp = jnp.zeros((g * c, g * r), dtype=weight_math.dtype)
    for j in range(g):  # static, tiny
        wp = wp.at[j * c:(j + 1) * c, j * r:(j + 1) * r].set(weight_math)
    return wp


def _choose_pack(m, c_in):
    # Pack g consecutive points per row: lane-dense x tile (prefer g*C_in near 128)
    # and g*R output lanes instead of R.
    for g in (4, 2):
        if m % g == 0 and g * c_in <= 512:
            return g
    return 1


def _choose_tile(n_rows, tile_m):
    # Largest-tile-that-fits policy, but keep >= 2 grid steps when possible so the
    # grid can be split across TensorCores (v7x megacore).
    if n_rows <= 16:
        return n_rows
    half = -(-n_rows // 2)          # cdiv(n_rows, 2)
    half = -(-half // 8) * 8        # round up to sublane multiple of 8
    tile = min(int(tile_m), half)
    tile = max(8, (tile // 8) * 8)  # multiple of 8 for the (8,128) block rule
    return tile


@functools.partial(jax.jit, static_argnames=("tile_m", "cast_to_bf16"))
def torgb_forward(x, weight, bias, skip=None, *, tile_m=4096, cast_to_bf16=False):
    """ToRGB forward.

    x:      (B, N, C_in)      point features
    weight: (dim_rgb, C_in)   PyTorch nn.Linear layout (out_features, in_features)
    bias:   (dim_rgb,)
    skip:   (B, N, dim_rgb) or None
    returns (B, N, dim_rgb) in x's dtype.
    """
    B, N, C_in = x.shape
    R, C_in_w = weight.shape
    assert C_in_w == C_in, "weight must be (dim_rgb, in_dim)"
    M = B * N
    orig_dtype = x.dtype

    g = _choose_pack(M, C_in)
    n_rows = M // g
    Kp = g * C_in
    Rp = g * R

    x2 = x.reshape(n_rows, Kp)                       # free: contiguous row-major reshape
    if cast_to_bf16:
        x2 = x2.astype(jnp.bfloat16)

    w_math = jnp.transpose(weight).astype(x2.dtype)  # (C_in, R) math layout, tiny
    wp = _pack_weight(w_math, g)                     # (Kp, Rp)
    bp = jnp.tile(bias.astype(jnp.float32), (g,)).reshape(1, Rp)

    tile = _choose_tile(n_rows, tile_m)
    grid = (pl.cdiv(n_rows, tile),)

    x_spec = pl.BlockSpec((tile, Kp), lambda i: (i, 0))
    w_spec = pl.BlockSpec((Kp, Rp), lambda i: (0, 0))   # constant block index: fetched once
    b_spec = pl.BlockSpec((1, Rp), lambda i: (0, 0))
    o_spec = pl.BlockSpec((tile, Rp), lambda i: (i, 0))

    compiler_params = pltpu.CompilerParams(
        dimension_semantics=("parallel",),
        vmem_limit_bytes=48 * 1024 * 1024,
    )
    out_shape = jax.ShapeDtypeStruct((n_rows, Rp), orig_dtype)

    if skip is None:
        out2 = pl.pallas_call(
            _torgb_kernel,
            out_shape=out_shape,
            grid_spec=pltpu.PrefetchScalarGridSpec(
                num_scalar_prefetch=0,
                grid=grid,
                in_specs=[x_spec, w_spec, b_spec],
                out_specs=o_spec,
            ),
            compiler_params=compiler_params,
        )(x2, wp, bp)
    else:
        skip2 = skip.reshape(n_rows, Rp)   # native dtype; cast to f32 inside the kernel
        s_spec = pl.BlockSpec((tile, Rp), lambda i: (i, 0))
        out2 = pl.pallas_call(
            _torgb_skip_kernel,
            out_shape=out_shape,
            grid_spec=pltpu.PrefetchScalarGridSpec(
                num_scalar_prefetch=0,
                grid=grid,
                in_specs=[x_spec, w_spec, b_spec, s_spec],
                out_specs=o_spec,
            ),
            compiler_params=compiler_params,
        )(x2, wp, bp, skip2)

    return out2.reshape(B, N, R)


if __name__ == "__main__":
    # Small, deterministic setup consistent with ToRGB(in_dim=32, dim_rgb=3).
    B, N, C_in, dim_rgb = 2, 256, 32, 3

    key = jax.random.PRNGKey(0)
    kx, kw, kb, ks = jax.random.split(key, 4)

    x = jax.random.normal(kx, (B, N, C_in), dtype=jnp.float32)
    skip = jax.random.normal(ks, (B, N, dim_rgb), dtype=jnp.float32)

    # nn.Linear default init: U(-1/sqrt(in_dim), 1/sqrt(in_dim)); PyTorch weight is (out, in).
    bound = 1.0 / (C_in ** 0.5)
    weight = jax.random.uniform(kw, (dim_rgb, C_in), jnp.float32, -bound, bound)
    bias = jax.random.uniform(kb, (dim_rgb,), jnp.float32, -bound, bound)

    # Path 1: with skip.
    out = jax.block_until_ready(torgb_forward(x, weight, bias, skip))
    ref = jnp.einsum("bnc,rc->bnr", x, weight) + bias[None, None, :] + skip
    assert out.shape == (B, N, dim_rgb)
    assert jnp.allclose(out, ref, atol=1e-4, rtol=1e-4), "mismatch vs reference (skip path)"

    # Path 2: skip=None specialized kernel (no zeros tensor streamed).
    out_ns = jax.block_until_ready(torgb_forward(x, weight, bias, None))
    ref_ns = jnp.einsum("bnc,rc->bnr", x, weight) + bias[None, None, :]
    assert jnp.allclose(out_ns, ref_ns, atol=1e-4, rtol=1e-4), "mismatch vs reference (no-skip path)"

    print("KERNEL_OK")
</pallas_src>

<mosaic_0001>
module attributes {stable_mosaic.version = 11 : i64} {
  func.func @_torgb_skip_kernel(%arg0: i32, %arg1: memref<64x128xf32, #tpu.memory_space<vmem>>, %arg2: memref<128x12xf32, #tpu.memory_space<vmem>>, %arg3: memref<1x12xf32, #tpu.memory_space<vmem>>, %arg4: memref<64x12xf32, #tpu.memory_space<vmem>>, %arg5: memref<64x12xf32, #tpu.memory_space<vmem>>) attributes {dimension_semantics = [#tpu.dimension_semantics<parallel>], iteration_bounds = array<i64: 2>, scalar_prefetch = 0 : i64, scratch_operands = 0 : i64, tpu.core_type = #tpu.core_type<tc>, window_params = [{transform_indices = @transform_0, window_bounds = array<i64: 64, 128>}, {pipeline_mode = #tpu.pipeline_mode<synchronous>, transform_indices = @transform_1, window_bounds = array<i64: 128, 12>}, {pipeline_mode = #tpu.pipeline_mode<synchronous>, transform_indices = @transform_2, window_bounds = array<i64: 1, 12>}, {transform_indices = @transform_3, window_bounds = array<i64: 64, 12>}, {transform_indices = @transform_4, window_bounds = array<i64: 64, 12>}]} {
    %c0 = arith.constant 0 : index
    %c0_0 = arith.constant 0 : index
    %0 = vector.load %arg1[%c0, %c0_0] : memref<64x128xf32, #tpu.memory_space<vmem>>, vector<64x128xf32>
    %c0_1 = arith.constant 0 : index
    %c0_2 = arith.constant 0 : index
    %1 = vector.load %arg2[%c0_1, %c0_2] : memref<128x12xf32, #tpu.memory_space<vmem>>, vector<128x12xf32>
    %cst = arith.constant dense<0.000000e+00> : vector<64x12xf32>
    %2 = tpu.matmul %0, %1, %cst {dimension_numbers = #tpu.dot_dimension_numbers<[1], [0], [0], [1], [0, 0, 1, 1], [], []>} : vector<64x128xf32>, vector<128x12xf32>, vector<64x12xf32> -> vector<64x12xf32>
    %c0_3 = arith.constant 0 : index
    %c0_4 = arith.constant 0 : index
    %3 = vector.load %arg3[%c0_3, %c0_4] : memref<1x12xf32, #tpu.memory_space<vmem>>, vector<1x12xf32>
    %4 = vector.broadcast %3 : vector<1x12xf32> to vector<64x12xf32>
    %5 = arith.addf %2, %4 : vector<64x12xf32>
    %c0_5 = arith.constant 0 : index
    %c0_6 = arith.constant 0 : index
    %6 = vector.load %arg4[%c0_5, %c0_6] : memref<64x12xf32, #tpu.memory_space<vmem>>, vector<64x12xf32>
    %7 = arith.addf %5, %6 : vector<64x12xf32>
    %c0_7 = arith.constant 0 : index
    %c0_8 = arith.constant 0 : index
    %8 = vector.load %arg5[%c0_7, %c0_8] : memref<64x12xf32, #tpu.memory_space<vmem>>, vector<64x12xf32>
    tpu.vector_store %arg5[%c0_7, %c0_8], %7 {strides = array<i32>} : memref<64x12xf32, #tpu.memory_space<vmem>>, vector<64x12xf32>,
    return
  }
  func.func @transform_0(%arg0: i32) -> (i32, i32) {
    %c0_i32 = arith.constant 0 : i32
    %c0_i32_0 = arith.constant 0 : i32
    return %arg0, %c0_i32 : i32, i32
  }
  func.func @transform_1(%arg0: i32) -> (i32, i32) {
    %c0_i32 = arith.constant 0 : i32
    %c0_i32_0 = arith.constant 0 : i32
    %c0_i32_1 = arith.constant 0 : i32
    return %c0_i32, %c0_i32_0 : i32, i32
  }
  func.func @transform_2(%arg0: i32) -> (i32, i32) {
    %c0_i32 = arith.constant 0 : i32
    %c0_i32_0 = arith.constant 0 : i32
    %c0_i32_1 = arith.constant 0 : i32
    return %c0_i32, %c0_i32_0 : i32, i32
  }
  func.func @transform_3(%arg0: i32) -> (i32, i32) {
    %c0_i32 = arith.constant 0 : i32
    %c0_i32_0 = arith.constant 0 : i32
    return %arg0, %c0_i32 : i32, i32
  }
  func.func @transform_4(%arg0: i32) -> (i32, i32) {
    %c0_i32 = arith.constant 0 : i32
    %c0_i32_0 = arith.constant 0 : i32
    return %arg0, %c0_i32 : i32, i32
  }
}

</mosaic_0001>

<bundles_post_ra>
// kernel: tile.8
= control target key start
LH: loop header
LB: loop body
LE: loop exit
PB: predicated region body
PF: predicated region fallthrough
CT: control target
= control target key end

     0   :  { %s22_s0 = inlined_call_operand.vmem [shape: f32[3], index: 0, kind: input, shape index: {}]   ;;  %s23_s1 = inlined_call_operand.vmem [shape: f32[4,3], index: 1, kind: output, shape index: {}]  }
   0x1   :  { %v4_v0 = vld [vmem:[%s22_s0] ss:$0 sm:$0xff] }
   0x2   :  { %5 = vst [vmem:[%s23_s1] sm:$0xf] %v4_v0 }

// kernel: tile.9
= control target key start
LH: loop header
LB: loop body
LE: loop exit
PB: predicated region body
PF: predicated region fallthrough
CT: control target
= control target key end

     0   :  { %s37_s8 = smov 3   ;;  %s38_s9 = smov 6   ;;  %vm7_vm0 = vcmask 23552   ;;  %vm13_vm1 = vcmask 97352   ;;  %vm19_vm2 = vcmask 72752   ;;  %vm25_vm3 = vcmask 48152   ;;  %s55_s0 = inlined_call_operand.vmem [shape: f32[4,3], index: 0, kind: input, shape index: {}]   ;;  %s56_s1 = inlined_call_operand.vmem [shape: f32[1,12], index: 1, kind: output, shape index: {}]  }
   0x1   :  { %v4_v0 = vld [vmem:[%s55_s0] sm:$0xf]  ;;  %s36_s0 = smov 9  }
   0x2   :  { %5 = vst [vmem:[#allocation1] sm:$0xf] %v4_v0 }
   0x9   :  { %v10_v1 = vld [vmem:[#allocation1 + $0x3] sm:$0x1]   ;;  %v22_v2 = vld [vmem:[#allocation1 + $0x1] sm:$0x1]   ;;  %v16_v3 = vld [vmem:[#allocation1 + $0x2] sm:$0x1]  }
   0xa   :  { %11 = vrot.lane.b32.xlu0 %v10_v1, %s36_s0  ;;  %23 = vrot.lane.b32.xlu1 %v22_v2, %s37_s8  ;;  %v6_v4 = vld [vmem:[#allocation1] sm:$0x1]  }
   0xb   :  { %8 = vst.msk [vmem:[#allocation0] sm:$0x1] %vm7_vm0, %v6_v4  }
  0x12   :  { %17 = vrot.lane.b32.xlu0 %v16_v3, %s38_s9 }
  0x7c   :  { %v12_v5 = vpop.permute.xlu0 %11   ;;  %v24_v6 = vpop.permute.xlu1 %23  }
  0x7d   :  { %14 = vst.msk [vmem:[#allocation0] sm:$0x1] %vm13_vm1, %v12_v5  }
  0x84   :  { %v18_v7 = vpop.permute.xlu0 %17  }
  0x85   :  { %20 = vst.msk [vmem:[#allocation0] sm:$0x1] %vm19_vm2, %v18_v7  }
  0x86   :  { %26 = vst.msk [vmem:[#allocation0] sm:$0x1] %vm25_vm3, %v24_v6  }
  0x8d   :  { %v29_v8 = vld [vmem:[#allocation0] sm:$0x1] }
  0x8e   :  { %32 = vst [vmem:[%s56_s1] sm:$0x1] %v29_v8 }

// kernel: torgb_forward.1
= control target key start
LH: loop header
LB: loop body
LE: loop exit
PB: predicated region body
PF: predicated region fallthrough
CT: control target
= control target key end

     0   :  { %s488_s15 = smov 0   ;;  %s594_s0 = inlined_call_operand.vmem [shape: f32[128,128], index: 0, kind: input, shape index: {}]   ;;  %s595_s1 = inlined_call_operand.vmem [shape: f32[128,12], index: 1, kind: input, shape index: {}]   ;;  %s596_s2 = inlined_call_operand.vmem [shape: f32[1,12], index: 2, kind: input, shape index: {}]   ;;  %s597_s3 = inlined_call_operand.vmem [shape: f32[128,12], index: 3, kind: input, shape index: {}]   ;;  %s598_s4 = inlined_call_operand.vmem [shape: f32[128,12], index: 4, kind: output, shape index: {}]  }
   0x1 LB: > { %s385_s16 = sadd.s32 4294967295, %s461_s15   ;;  %p389_p0 = scmp.ge.s32.totalorder %s461_s15, 1  ;;  %s461_s15 = sphi %s488_s15, %s14_s15  }
   0x2   : > { %p174_p1 = scmp.lt.s32.totalorder %s461_s15, 3 }
   0x4   : > { %p175_p2 = pnand %p389_p0, %p174_p1 }
   0x5   : > { %s390_s7 = sshll.u32 (!%p175_p2), %s385_s16, 3 }
   0x6   : > { %178 = sbr.rel (%p175_p2) target bundleno = 189 (0xbd), region = 36  ;;  %p206_p3 = scmp.lt.s32.totalorder (!%p175_p2), %s390_s7, 15 }
   0xb   : > { %v246_v0 = vld [vmem:[%s595_s1 + $0x78] sm:$0xff]  ;;  %v245_v1 = vld [vmem:[%s595_s1 + $0x70] sm:$0xff]  ;;  %v244_v2 = vld [vmem:[%s595_s1 + $0x68] sm:$0xff]  ;;  %s600_s7 = smov (!%p206_p3, %s390_s7), 15  ;;  %vm308_vm0 = vcmask 97280  }
   0xc   : > { %399 = vmatpush.msra.mxu2 %v246_v0  ;;  %400 = vmatpush.msra.mxu3 %v246_v0  ;;  %v243_v3 = vld [vmem:[%s595_s1 + $0x60] sm:$0xff]  ;;  %v242_v4 = vld [vmem:[%s595_s1 + $0x58] sm:$0xff]  ;;  %v241_v5 = vld [vmem:[%s595_s1 + $0x50] sm:$0xff]  ;;  %s537_s19 = sshll.u32 %s600_s7, 3 }
   0xd   : > { %251 = vmatpush.msra.mxu0 %v246_v0  ;;  %398 = vmatpush.msra.mxu1 %v246_v0  ;;  %v240_v6 = vld [vmem:[%s595_s1 + $0x48] sm:$0xff]  ;;  %v239_v7 = vld [vmem:[%s595_s1 + $0x40] sm:$0xff]  ;;  %v238_v8 = vld [vmem:[%s595_s1 + $0x38] sm:$0xff]  ;;  %s209_s26 = scalar_lea.vmem %s594_s0, %s537_s19  ;;  %s556_s5 = scalar_lea.vmem %s597_s3, %s537_s19 }
   0xe   : > { %402 = vmatpush.msra.mxu2 %v245_v1  ;;  %403 = vmatpush.msra.mxu3 %v245_v1  ;;  %v237_v9 = vld [vmem:[%s595_s1 + $0x30] sm:$0xff]  ;;  %v236_v10 = vld [vmem:[%s595_s1 + $0x28] sm:$0xff]  ;;  %v235_v11 = vld [vmem:[%s595_s1 + $0x20] sm:$0xff]  ;;  %s567_s10 = scalar_lea.vmem %s598_s4, %s537_s19 }
   0xf   : > { %252 = vmatpush.msra.mxu0 %v245_v1  ;;  %401 = vmatpush.msra.mxu1 %v245_v1  ;;  %v234_v12 = vld [vmem:[%s595_s1 + $0x18] sm:$0xff]  ;;  %v233_v13 = vld [vmem:[%s595_s1 + $0x10] sm:$0xff]  ;;  %v232_v14 = vld [vmem:[%s595_s1 + $0x8] sm:$0xff] }
  0x10   : > { %405 = vmatpush.msra.mxu2 %v244_v2  ;;  %406 = vmatpush.msra.mxu3 %v244_v2  ;;  %v231_v15 = vld [vmem:[%s595_s1] sm:$0xff]  ;;  %v229_v17 = vld [vmem:[%s209_s26 + $0x30] sm:$0xff]  ;;  %v228_v20 = vld [vmem:[%s209_s26 + $0x28] sm:$0xff] }
  0x11   : > { %253 = vmatpush.msra.mxu0 %v244_v2  ;;  %404 = vmatpush.msra.mxu1 %v244_v2  ;;  %v227_v16 = vld [vmem:[%s209_s26 + $0x20] sm:$0xff]  ;;  %v225_v19 = vld [vmem:[%s209_s26 + $0x10] sm:$0xff]  ;;  %v230_v21 = vld [vmem:[%s209_s26 + $0x38] sm:$0xff] }
  0x12   : > { %408 = vmatpush.msra.mxu2 %v243_v3  ;;  %409 = vmatpush.msra.mxu3 %v243_v3  ;;  %v223_v18 = vld [vmem:[%s209_s26] sm:$0xff]  ;;  %v224_v22 = vld [vmem:[%s209_s26 + $0x8] sm:$0xff]  ;;  %v226_v23 = vld [vmem:[%s209_s26 + $0x18] sm:$0xff] }
  0x13   : > { %254 = vmatpush.msra.mxu0 %v243_v3  ;;  %407 = vmatpush.msra.mxu1 %v243_v3  ;;  %v454_v24 = vld [vmem:[%s596_s2] ss:$0 sm:$0xff]  ;;  %v294_v28 = vld [vmem:[%s556_s5 + $0x10] sm:$0xff]  ;;  %v293_v42 = vld [vmem:[%s556_s5 + $0x8] sm:$0xff] }
  0x14   : > { %411 = vmatpush.msra.mxu2 %v242_v4  ;;  %412 = vmatpush.msra.mxu3 %v242_v4  ;;  %v292_v26 = vld [vmem:[%s556_s5] sm:$0xff]  ;;  %v298_v36 = vld [vmem:[%s556_s5 + $0x30] sm:$0xff]  ;;  %v295_v44 = vld [vmem:[%s556_s5 + $0x18] sm:$0xff] }
  0x15   : > { %255 = vmatpush.msra.mxu0 %v242_v4  ;;  %410 = vmatpush.msra.mxu1 %v242_v4  ;;  %v296_v34 = vld [vmem:[%s556_s5 + $0x20] sm:$0xff]  ;;  %v297_v50 = vld [vmem:[%s556_s5 + $0x28] sm:$0xff]  ;;  %v299_v52 = vld [vmem:[%s556_s5 + $0x38] sm:$0xff] }
  0x16   : > { %414 = vmatpush.msra.mxu2 %v241_v5  ;;  %415 = vmatpush.msra.mxu3 %v241_v5 }
  0x17   : > { %256 = vmatpush.msra.mxu0 %v241_v5  ;;  %413 = vmatpush.msra.mxu1 %v241_v5 }
  0x18   : > { %417 = vmatpush.msra.mxu2 %v240_v6  ;;  %418 = vmatpush.msra.mxu3 %v240_v6 }
  0x19   : > { %257 = vmatpush.msra.mxu0 %v240_v6  ;;  %416 = vmatpush.msra.mxu1 %v240_v6 }
  0x1a   : > { %420 = vmatpush.msra.mxu2 %v239_v7  ;;  %421 = vmatpush.msra.mxu3 %v239_v7 }
  0x1b   : > { %258 = vmatpush.msra.mxu0 %v239_v7  ;;  %419 = vmatpush.msra.mxu1 %v239_v7 }
  0x1c   : > { %423 = vmatpush.msra.mxu2 %v238_v8  ;;  %424 = vmatpush.msra.mxu3 %v238_v8 }
  0x1d   : > { %259 = vmatpush.msra.mxu0 %v238_v8  ;;  %422 = vmatpush.msra.mxu1 %v238_v8 }
  0x1e   : > { %426 = vmatpush.msra.mxu2 %v237_v9  ;;  %427 = vmatpush.msra.mxu3 %v237_v9 }
  0x1f   : > { %260 = vmatpush.msra.mxu0 %v237_v9  ;;  %425 = vmatpush.msra.mxu1 %v237_v9 }
  0x20   : > { %429 = vmatpush.msra.mxu2 %v236_v10  ;;  %430 = vmatpush.msra.mxu3 %v236_v10 }
  0x21   : > { %261 = vmatpush.msra.mxu0 %v236_v10  ;;  %428 = vmatpush.msra.mxu1 %v236_v10 }
  0x22   : > { %432 = vmatpush.msra.mxu2 %v235_v11  ;;  %433 = vmatpush.msra.mxu3 %v235_v11 }
  0x23   : > { %262 = vmatpush.msra.mxu0 %v235_v11  ;;  %431 = vmatpush.msra.mxu1 %v235_v11 }
  0x24   : > { %435 = vmatpush.msra.mxu2 %v234_v12  ;;  %436 = vmatpush.msra.mxu3 %v234_v12 }
  0x25   : > { %263 = vmatpush.msra.mxu0 %v234_v12  ;;  %434 = vmatpush.msra.mxu1 %v234_v12 }
  0x26   : > { %438 = vmatpush.msra.mxu2 %v233_v13  ;;  %439 = vmatpush.msra.mxu3 %v233_v13 }
  0x27   : > { %264 = vmatpush.msra.mxu0 %v233_v13  ;;  %437 = vmatpush.msra.mxu1 %v233_v13 }
  0x28   : > { %441 = vmatpush.msra.mxu2 %v232_v14  ;;  %442 = vmatpush.msra.mxu3 %v232_v14 }
  0x29   : > { %265 = vmatpush.msra.mxu0 %v232_v14  ;;  %440 = vmatpush.msra.mxu1 %v232_v14 }
  0x2a   : > { %444 = vmatpush.msra.mxu2 %v231_v15  ;;  %445 = vmatpush.msra.mxu3 %v231_v15 }
  0x2b   : > { %279 = vmatmul.f32.vlgmr.msra.gmra.mxu2 %v227_v16  ;;  %285 = vmatmul.f32.vlgmr.msra.gmra.mxu3 %v229_v17 }
  0x2c   : > { %266 = vmatpush.msra.mxu0 %v231_v15  ;;  %443 = vmatpush.msra.mxu1 %v231_v15 }
  0x2d   : > { %267 = vmatmul.f32.vlgmr.msra.gmra.mxu0 %v223_v18  ;;  %273 = vmatmul.f32.vlgmr.msra.gmra.mxu1 %v225_v19 }
  0x33   : > { %282 = vmatmul.f32.gmra.mxu2 %v228_v20  ;;  %288 = vmatmul.f32.gmra.mxu3 %v230_v21 }
  0x35   : > { %270 = vmatmul.f32.gmra.mxu0 %v224_v22  ;;  %276 = vmatmul.f32.gmra.mxu1 %v226_v23 }
  0xaa   : > { %v268_v25 = vpop.f32.mrf.mxu0  ;;  %v274_v27 = vpop.f32.mrf.mxu1 }
  0xab   : > { %v269_v29 = vadd.f32 %v454_v24, %v268_v25  ;;  %v275_v30 = vadd.f32 %v454_v24, %v274_v27 }
  0xad   : > { %v300_v31 = vadd.f32 %v292_v26, %v269_v29  ;;  %v302_v32 = vadd.f32 %v294_v28, %v275_v30 }
  0xae   : > { %v280_v33 = vpop.f32.mrf.mxu2  ;;  %v286_v35 = vpop.f32.mrf.mxu3 }
  0xaf   : > { %309 = vst.msk [vmem:[%s567_s10] sm:$0xff] %vm308_vm0, %v300_v31  ;;  %v281_v37 = vadd.f32 %v454_v24, %v280_v33  ;;  %v287_v38 = vadd.f32 %v454_v24, %v286_v35 }
  0xb0   : > { %311 = vst.msk [vmem:[%s567_s10 + $0x10] sm:$0xff] %vm308_vm0, %v302_v32 }
  0xb1   : > { %v304_v39 = vadd.f32 %v296_v34, %v281_v37  ;;  %v306_v40 = vadd.f32 %v298_v36, %v287_v38 }
  0xb2   : > { %v271_v41 = vpop.f32.mrf.mxu0  ;;  %v277_v43 = vpop.f32.mrf.mxu1 }
  0xb3   : > { %313 = vst.msk [vmem:[%s567_s10 + $0x20] sm:$0xff] %vm308_vm0, %v304_v39  ;;  %v272_v45 = vadd.f32 %v454_v24, %v271_v41  ;;  %v278_v46 = vadd.f32 %v454_v24, %v277_v43 }
  0xb4   : > { %315 = vst.msk [vmem:[%s567_s10 + $0x30] sm:$0xff] %vm308_vm0, %v306_v40 }
  0xb5   : > { %v301_v47 = vadd.f32 %v293_v42, %v272_v45  ;;  %v303_v48 = vadd.f32 %v295_v44, %v278_v46 }
  0xb6   : > { %v283_v49 = vpop.f32.mrf.mxu2  ;;  %v289_v51 = vpop.f32.mrf.mxu3 }
  0xb7   : > { %310 = vst.msk [vmem:[%s567_s10 + $0x8] sm:$0xff] %vm308_vm0, %v301_v47  ;;  %v284_v53 = vadd.f32 %v454_v24, %v283_v49  ;;  %v290_v54 = vadd.f32 %v454_v24, %v289_v51 }
  0xb8   : > { %312 = vst.msk [vmem:[%s567_s10 + $0x18] sm:$0xff] %vm308_vm0, %v303_v48 }
  0xb9   : > { %v305_v55 = vadd.f32 %v297_v50, %v284_v53  ;;  %v307_v56 = vadd.f32 %v299_v52, %v290_v54 }
  0xbb   : > { %314 = vst.msk [vmem:[%s567_s10 + $0x28] sm:$0xff] %vm308_vm0, %v305_v55 }
  0xbc   : > { %316 = vst.msk [vmem:[%s567_s10 + $0x38] sm:$0xff] %vm308_vm0, %v307_v56 }
  0xbd PF: > { %s14_s15 = sadd.s32 1, %s461_s15  }
  0xbe   : > { %p11_p4 = scmp.ge.s32.totalorder %s14_s15, 4  }
  0xc0   :  { %13 = sbr.rel (!%p11_p4) target bundleno = 1 (0x1), region = 69 }

</bundles_post_ra>
